<compile_context>
chip_gen: v7x
topology: tpu7x:2x2x1
jax: 0.10.0
libtpu: 0.0.40
codegen_flags: <defaults>
</compile_context>

<pallas_src>
import numpy as np
import jax
import jax.numpy as jnp
from jax.experimental import pallas as pl
from jax.experimental.pallas import tpu as pltpu


def _basic_block_kernel(x_ref, w1_ref, b1_ref, w2_ref, b2_ref, o_ref):
    # Weights/biases are resident (constant index_map); load once per step.
    w1 = w1_ref[...]                       # (P, C)  bf16, BN1 scale folded in
    w2 = w2_ref[...]                       # (P, P)  bf16, BN2 scale folded in
    b1 = b1_ref[...]                       # (P, 1)  f32
    b2 = b2_ref[...]                       # (P, 1)  f32

    for i in range(x_ref.shape[0]):        # Bt is static -> unrolled
        xv = x_ref[i]                      # (C, tile_l) in input dtype
        x32 = xv.astype(jnp.float32)       # residual kept in f32

        # conv1 (1x1) + bn1 + relu
        h = jnp.dot(w1, xv.astype(jnp.bfloat16),
                    preferred_element_type=jnp.float32)
        h = jnp.maximum(h + b1, 0.0)

        # conv2 (1x1) + bn2 + residual + relu   (downsample=None => residual=x)
        y = jnp.dot(w2, h.astype(jnp.bfloat16),
                    preferred_element_type=jnp.float32)
        o_ref[i] = jnp.maximum(y + b2 + x32, 0.0).astype(o_ref.dtype)


def _vmem_capacity_bytes():
    """Per-TensorCore VMEM (generation-aware); conservative fallback = v7x."""
    try:
        info = pltpu.get_tpu_info()
        cap = getattr(info, "vmem_capacity_bytes", None)
        if cap:
            return int(cap)
    except Exception:
        pass
    return 64 * 2**20


def basic_block_forward(x_ncl, params, *, tile_l=None, batch_tile=None):
    """x_ncl: (B, C, L) float32 or bfloat16, C == planes (no downsample)."""
    B, C, L = x_ncl.shape
    P, Cin = params["w1"].shape
    assert Cin == C, "w1 must be (planes, inplanes)"
    assert params["w2"].shape == (P, P)
    assert P == C, "downsample is None => inplanes must equal planes"

    # Fold BN scale into the conv weights; bf16 operands for the MXU.
    w1 = (params["w1"] * params["s1"][:, None]).astype(jnp.bfloat16)
    w2 = (params["w2"] * params["s2"][:, None]).astype(jnp.bfloat16)
    b1 = params["b1"].reshape(P, 1).astype(jnp.float32)
    b2 = params["b2"].reshape(P, 1).astype(jnp.float32)

    in_isz = x_ncl.dtype.itemsize
    out_isz = in_isz                                    # output dtype == input dtype

    # ---- generation-aware VMEM budget -------------------------------------
    cap = _vmem_capacity_bytes()
    budget = (cap * 3) // 4                             # ~48 MiB v7x, ~96 MiB v5e/v6e

    # Resident weights (pipeline double-buffers them; counted twice).
    weight_vmem = 2 * ((w1.size + w2.size) * 2 + (b1.size + b2.size) * 4)

    # Per lane-column cost: 2x-buffered in + 2x-buffered out tiles, plus live
    # kernel temporaries (x32, xb, h, hb, y) ~= 6*C + 10*P bytes per column.
    per_col = 2 * C * in_isz + 2 * P * out_isz + 6 * C + 10 * P
    max_cols = max(128, (budget - weight_vmem) // per_col)

    # ---- L (lane-axis) tile selection: size by bytes, avoid any wrapper pad --
    if tile_l is None:
        if L <= max_cols:
            tile_l = L                                  # full-dim block (always legal)
        else:
            cap_l = (max_cols // 128) * 128
            tile_l = 0
            t = cap_l
            while t >= max(128, cap_l // 2):            # prefer a tile that divides L
                if L % t == 0:
                    tile_l = t
                    break
                t -= 128
            if tile_l == 0:
                # Ragged tail: Pallas masks the partial final-block writeback and
                # the math is lane-independent, so the tail lanes are harmless.
                tile_l = cap_l
    else:
        tile_l = min(tile_l, L)
        if tile_l < L:
            tile_l = max(128, (tile_l // 128) * 128)
    n_l = pl.cdiv(L, tile_l)

    # ---- batch tile: amortize per-grid-step overhead for small C*L ---------
    if batch_tile is None:
        want = max(1, max_cols // tile_l)
        Bt = 1
        for d in range(min(B, want), 0, -1):            # largest divisor of B <= want
            if B % d == 0:
                Bt = d
                break
    else:
        Bt = max(1, min(batch_tile, B))
        while B % Bt != 0:
            Bt -= 1

    # v7x has 2 TensorCores: keep >=2 "parallel" grid steps when possible.
    if (B // Bt) * n_l < 2:
        if Bt > 1:
            for d in range(B // 2, 0, -1):
                if B % d == 0:
                    Bt = d
                    break
        elif n_l == 1 and tile_l == L and L >= 256:
            half = ((L // 2) // 128) * 128
            if half >= 128 and L % half == 0:
                tile_l = half
        n_l = pl.cdiv(L, tile_l)

    # ---- explicit VMEM limit (v5e default scoped VMEM is only 16 MiB) ------
    cols = Bt * tile_l
    est_usage = weight_vmem + cols * per_col + (2 << 20)
    vmem_limit = int(min(budget, max(32 << 20, est_usage)))

    const = lambda b, l: (0, 0)

    out = pl.pallas_call(
        _basic_block_kernel,
        out_shape=jax.ShapeDtypeStruct((B, P, L), x_ncl.dtype),
        grid_spec=pltpu.PrefetchScalarGridSpec(
            num_scalar_prefetch=0,
            grid=(B // Bt, n_l),
            in_specs=[
                pl.BlockSpec((Bt, C, tile_l), lambda b, l: (b, 0, l)),  # x tile
                pl.BlockSpec((P, C), const),                            # w1 * s1 (bf16)
                pl.BlockSpec((P, 1), const),                            # b1 (f32)
                pl.BlockSpec((P, P), const),                            # w2 * s2 (bf16)
                pl.BlockSpec((P, 1), const),                            # b2 (f32)
            ],
            out_specs=pl.BlockSpec((Bt, P, tile_l), lambda b, l: (b, 0, l)),
        ),
        compiler_params=pltpu.CompilerParams(
            dimension_semantics=("parallel", "parallel"),
            vmem_limit_bytes=vmem_limit),
    )(x_ncl, w1, b1, w2, b2)
    return out


def make_params(key, inplanes, planes, eps=1e-5):
    """Deterministic synthetic parameters (conv weights + folded eval-mode BN)."""
    ks = jax.random.split(key, 10)

    def conv_w(k, cout, cin):
        # PyTorch Conv1d weight is (cout, cin, 1); drop the trailing kernel dim.
        return 0.1 * jax.random.normal(k, (cout, cin), jnp.float32)

    def bn_fold(kg, kb, km, kv, c):
        gamma = 1.0 + 0.1 * jax.random.normal(kg, (c,), jnp.float32)
        beta = 0.1 * jax.random.normal(kb, (c,), jnp.float32)
        rmean = 0.1 * jax.random.normal(km, (c,), jnp.float32)
        rvar = jnp.abs(jax.random.normal(kv, (c,), jnp.float32)) + 0.5
        scale = gamma * jax.lax.rsqrt(rvar + eps)
        bias = beta - rmean * scale
        return scale, bias

    w1 = conv_w(ks[0], planes, inplanes)
    s1, b1 = bn_fold(ks[1], ks[2], ks[3], ks[4], planes)
    w2 = conv_w(ks[5], planes, planes)
    s2, b2 = bn_fold(ks[6], ks[7], ks[8], ks[9], planes)
    return dict(w1=w1, s1=s1, b1=b1, w2=w2, s2=s2, b2=b2)


def reference_forward(x_ncl, p):
    """Pure-JAX f32 reference of the same BasicBlock math (for correctness)."""
    x = x_ncl.astype(jnp.float32)
    h = jnp.einsum("oc,bcl->bol", p["w1"], x)
    h = jnp.maximum(h * p["s1"][None, :, None] + p["b1"][None, :, None], 0.0)
    y = jnp.einsum("oc,bcl->bol", p["w2"], h)
    y = y * p["s2"][None, :, None] + p["b2"][None, :, None]
    return jnp.maximum(y + x, 0.0)


if __name__ == "__main__":
    # Small shapes consistent with the module: inplanes == planes (no downsample).
    batch, planes, length = 2, 32, 16
    inplanes = planes

    key = jax.random.PRNGKey(0)
    kx, kp = jax.random.split(key)
    x = jax.random.normal(kx, (batch, inplanes, length), jnp.float32)   # NCL
    params = make_params(kp, inplanes, planes)

    # f32 activations (bf16 MXU operands, f32 accumulation) vs all-f32 reference.
    out = jax.block_until_ready(basic_block_forward(x, params))
    ref = jax.block_until_ready(reference_forward(x, params))
    assert out.shape == (batch, planes, length) and out.dtype == x.dtype
    np.testing.assert_allclose(np.asarray(out), np.asarray(ref),
                               rtol=5e-2, atol=5e-2)

    # bf16 activations end-to-end (half the HBM traffic; f32 accumulation inside).
    x_bf = x.astype(jnp.bfloat16)
    out_bf = jax.block_until_ready(basic_block_forward(x_bf, params))
    ref_bf = jax.block_until_ready(reference_forward(x_bf.astype(jnp.float32), params))
    assert out_bf.shape == (batch, planes, length) and out_bf.dtype == jnp.bfloat16
    np.testing.assert_allclose(np.asarray(out_bf.astype(jnp.float32)),
                               np.asarray(ref_bf), rtol=1e-1, atol=1e-1)

    print("KERNEL_OK")
</pallas_src>

<mosaic_0001>
module attributes {stable_mosaic.version = 11 : i64} {
  func.func @_basic_block_kernel(%arg0: i32, %arg1: i32, %arg2: memref<1x32x16xf32, #tpu.memory_space<vmem>>, %arg3: memref<32x32xbf16, #tpu.memory_space<vmem>>, %arg4: memref<32x1xf32, #tpu.memory_space<vmem>>, %arg5: memref<32x32xbf16, #tpu.memory_space<vmem>>, %arg6: memref<32x1xf32, #tpu.memory_space<vmem>>, %arg7: memref<1x32x16xf32, #tpu.memory_space<vmem>>) attributes {dimension_semantics = [#tpu.dimension_semantics<parallel>, #tpu.dimension_semantics<parallel>], iteration_bounds = array<i64: 2, 1>, scalar_prefetch = 0 : i64, scratch_operands = 0 : i64, tpu.core_type = #tpu.core_type<tc>, window_params = [{transform_indices = @transform_0, window_bounds = array<i64: 1, 32, 16>}, {pipeline_mode = #tpu.pipeline_mode<synchronous>, transform_indices = @transform_1, window_bounds = array<i64: 32, 32>}, {pipeline_mode = #tpu.pipeline_mode<synchronous>, transform_indices = @transform_2, window_bounds = array<i64: 32, 1>}, {pipeline_mode = #tpu.pipeline_mode<synchronous>, transform_indices = @transform_3, window_bounds = array<i64: 32, 32>}, {pipeline_mode = #tpu.pipeline_mode<synchronous>, transform_indices = @transform_4, window_bounds = array<i64: 32, 1>}, {transform_indices = @transform_5, window_bounds = array<i64: 1, 32, 16>}]} {
    %c0 = arith.constant 0 : index
    %c0_0 = arith.constant 0 : index
    %0 = vector.load %arg3[%c0, %c0_0] : memref<32x32xbf16, #tpu.memory_space<vmem>>, vector<32x32xbf16>
    %c0_1 = arith.constant 0 : index
    %c0_2 = arith.constant 0 : index
    %1 = vector.load %arg5[%c0_1, %c0_2] : memref<32x32xbf16, #tpu.memory_space<vmem>>, vector<32x32xbf16>
    %c0_3 = arith.constant 0 : index
    %c0_4 = arith.constant 0 : index
    %2 = vector.load %arg4[%c0_3, %c0_4] : memref<32x1xf32, #tpu.memory_space<vmem>>, vector<32x1xf32>
    %c0_5 = arith.constant 0 : index
    %c0_6 = arith.constant 0 : index
    %3 = vector.load %arg6[%c0_5, %c0_6] : memref<32x1xf32, #tpu.memory_space<vmem>>, vector<32x1xf32>
    %c0_7 = arith.constant 0 : index
    %c0_8 = arith.constant 0 : index
    %c0_9 = arith.constant 0 : index
    %4 = vector.load %arg2[%c0_7, %c0_8, %c0_9] : memref<1x32x16xf32, #tpu.memory_space<vmem>>, vector<1x32x16xf32>
    %5 = vector.shape_cast %4 : vector<1x32x16xf32> to vector<32x16xf32>
    %6 = arith.truncf %5 : vector<32x16xf32> to vector<32x16xbf16>
    %cst = arith.constant dense<0.000000e+00> : vector<32x16xf32>
    %7 = tpu.matmul %0, %6, %cst {dimension_numbers = #tpu.dot_dimension_numbers<[1], [0], [0], [1], [0, 0, 1, 1], [], []>} : vector<32x32xbf16>, vector<32x16xbf16>, vector<32x16xf32> -> vector<32x16xf32>
    %8 = vector.broadcast %2 : vector<32x1xf32> to vector<32x16xf32>
    %9 = arith.addf %7, %8 : vector<32x16xf32>
    %cst_10 = arith.constant 0.000000e+00 : f32
    %10 = vector.broadcast %cst_10 : f32 to vector<32x16xf32>
    %11 = arith.maximumf %9, %10 : vector<32x16xf32>
    %12 = arith.truncf %11 : vector<32x16xf32> to vector<32x16xbf16>
    %cst_11 = arith.constant dense<0.000000e+00> : vector<32x16xf32>
    %13 = tpu.matmul %1, %12, %cst_11 {dimension_numbers = #tpu.dot_dimension_numbers<[1], [0], [0], [1], [0, 0, 1, 1], [], []>} : vector<32x32xbf16>, vector<32x16xbf16>, vector<32x16xf32> -> vector<32x16xf32>
    %14 = vector.broadcast %3 : vector<32x1xf32> to vector<32x16xf32>
    %15 = arith.addf %13, %14 : vector<32x16xf32>
    %16 = arith.addf %15, %5 : vector<32x16xf32>
    %cst_12 = arith.constant 0.000000e+00 : f32
    %17 = vector.broadcast %cst_12 : f32 to vector<32x16xf32>
    %18 = arith.maximumf %16, %17 : vector<32x16xf32>
    %c0_13 = arith.constant 0 : index
    %c0_14 = arith.constant 0 : index
    %c0_15 = arith.constant 0 : index
    %19 = vector.load %arg7[%c0_13, %c0_14, %c0_15] : memref<1x32x16xf32, #tpu.memory_space<vmem>>, vector<1x32x16xf32>
    %20 = vector.shape_cast %19 : vector<1x32x16xf32> to vector<32x16xf32>
    %21 = vector.shape_cast %18 : vector<32x16xf32> to vector<1x32x16xf32>
    tpu.vector_store %arg7[%c0_13, %c0_14, %c0_15], %21 {strides = array<i32>} : memref<1x32x16xf32, #tpu.memory_space<vmem>>, vector<1x32x16xf32>,
    return
  }
  func.func @transform_0(%arg0: i32, %arg1: i32) -> (i32, i32, i32) {
    %c0_i32 = arith.constant 0 : i32
    %c0_i32_0 = arith.constant 0 : i32
    return %arg0, %c0_i32, %arg1 : i32, i32, i32
  }
  func.func @transform_1(%arg0: i32, %arg1: i32) -> (i32, i32) {
    %c0_i32 = arith.constant 0 : i32
    %c0_i32_0 = arith.constant 0 : i32
    %c0_i32_1 = arith.constant 0 : i32
    return %c0_i32, %c0_i32_0 : i32, i32
  }
  func.func @transform_2(%arg0: i32, %arg1: i32) -> (i32, i32) {
    %c0_i32 = arith.constant 0 : i32
    %c0_i32_0 = arith.constant 0 : i32
    %c0_i32_1 = arith.constant 0 : i32
    return %c0_i32, %c0_i32_0 : i32, i32
  }
  func.func @transform_3(%arg0: i32, %arg1: i32) -> (i32, i32) {
    %c0_i32 = arith.constant 0 : i32
    %c0_i32_0 = arith.constant 0 : i32
    %c0_i32_1 = arith.constant 0 : i32
    return %c0_i32, %c0_i32_0 : i32, i32
  }
  func.func @transform_4(%arg0: i32, %arg1: i32) -> (i32, i32) {
    %c0_i32 = arith.constant 0 : i32
    %c0_i32_0 = arith.constant 0 : i32
    %c0_i32_1 = arith.constant 0 : i32
    return %c0_i32, %c0_i32_0 : i32, i32
  }
  func.func @transform_5(%arg0: i32, %arg1: i32) -> (i32, i32, i32) {
    %c0_i32 = arith.constant 0 : i32
    %c0_i32_0 = arith.constant 0 : i32
    return %arg0, %c0_i32, %arg1 : i32, i32, i32
  }
}

</mosaic_0001>

<bundles_post_ra>
// kernel: tpu_custom_call.1
= control target key start
LH: loop header
LB: loop body
LE: loop exit
PB: predicated region body
PF: predicated region fallthrough
CT: control target
= control target key end

     0   :  { %s683_s18 = smov 0   ;;  %s685_s19 = smov 0   ;;  %s767_s0 = inlined_call_operand.vmem [shape: f32[2,32,16], index: 0, kind: input, shape index: {}]   ;;  %s768_s1 = inlined_call_operand.vmem [shape: bf16[32,32], index: 1, kind: input, shape index: {}]   ;;  %s769_s2 = inlined_call_operand.vmem [shape: f32[32,1], index: 2, kind: input, shape index: {}]   ;;  %s770_s3 = inlined_call_operand.vmem [shape: bf16[32,32], index: 3, kind: input, shape index: {}]   ;;  %s771_s4 = inlined_call_operand.vmem [shape: f32[32,1], index: 4, kind: input, shape index: {}]   ;;  %s772_s5 = inlined_call_operand.vmem [shape: f32[2,32,16], index: 5, kind: output, shape index: {}]  }
   0x1   :  { %s687_s20 = smov 0  }
   0x2 LB: > { %s27_s21 = sadd.s32 1, %s646_s19  ;;  %p556_p0 = scmp.ge.s32.totalorder %s650_s20, 1  ;;  %s650_s20 = sphi %s687_s20, %s15_s20   ;;  %s646_s19 = sphi %s685_s19, %s774_s19   ;;  %s642_s18 = sphi %s683_s18, %s773_s18  }
   0x3   : > { %p29_p1 = scmp.ge.s32.totalorder %s27_s21, 2  ;;  %p206_p2 = scmp.lt.s32.totalorder %s650_s20, 3 }
   0x5   : > { %s776_s21 = smov (%p29_p1, %s27_s21), 0  ;;  %p207_p3 = pnand %p556_p0, %p206_p2 }
   0x6   : > { %p240_p4 = scmp.lt.s32.totalorder (!%p207_p3), %s642_s18, 1  ;;  %v624_v0 = vld [vmem:[%s768_s1] sm:$0xff] (!%p207_p3)   ;;  %vm309_vm0 = vcmask (!%p207_p3), 261120   ;;  %v267_v2 = vld [vmem:[%s769_s2 + $0x10] sm:$0xff] (!%p207_p3)  ;;  %v652_v3 = vmov (!%p207_p3), 0   ;;  %v266_v4 = vld [vmem:[%s769_s2 + $0x8] sm:$0xff] (!%p207_p3) }
   0x7   : > { %210 = sbr.rel (%p207_p3) target bundleno = 479 (0x1df), region = 40  ;;  %585 = vmatprep.mubr.msk.bf16.mxu0 (!%p207_p3), %vm309_vm0, %v624_v0  ;;  %v265_v1 = vld [vmem:[%s769_s2] sm:$0xff] (!%p207_p3)  ;;  %622 = vset.pattern.permute.xlu0 (!%p207_p3), %v652_v3  ;;  %v268_v5 = vld [vmem:[%s769_s2 + $0x18] sm:$0xff] (!%p207_p3)  ;;  %v270_v13 = vld [vmem:[%s771_s4 + $0x8] sm:$0xff] (!%p207_p3)  ;;  %vm464_vm1 = vcmask (!%p207_p3), 130048  }
   0x8   : > { %623 = vset.pattern.permute.xlu1 (!%p207_p3), %v652_v3  ;;  %281 = vperm.xlu0 (!%p207_p3), %622, %v265_v1   ;;  %v269_v12 = vld [vmem:[%s771_s4] sm:$0xff] (!%p207_p3)  ;;  %v625_v14 = vld [vmem:[%s768_s1 + $0x8] sm:$0xff] (!%p207_p3)   ;;  %v271_v15 = vld [vmem:[%s771_s4 + $0x10] sm:$0xff] (!%p207_p3) }
   0x9   : > { %291 = vperm.xlu1 (!%p207_p3), %623, %v267_v2   ;;  %v272_v16 = vld [vmem:[%s771_s4 + $0x18] sm:$0xff] (!%p207_p3)  ;;  %v626_v17 = vld [vmem:[%s770_s3] sm:$0xff] (!%p207_p3)   ;;  %v627_v36 = vld [vmem:[%s770_s3 + $0x8] sm:$0xff] (!%p207_p3)  }
   0xa   : > { %593 = vmatprep.mubr.msk.bf16.mxu1 (!%p207_p3), %vm309_vm0, %v626_v17 }
   0xc   : > { %286 = vperm.xlu0 (!%p207_p3), %622, %v266_v4  }
   0xd   : > { %296 = vperm.xlu1 (!%p207_p3), %623, %v268_v5  }
   0xe   : > { %s778_s18 = smov (!%p240_p4, %s642_s18), 1 }
   0xf   : > { %s571_s28 = sshll.u32 %s778_s18, 5 }
  0x10   : > { %s247_s10 = scalar_lea.vmem %s767_s0, %s571_s28  ;;  %373 = vperm.xlu0 %622, %v269_v12   ;;  %s255_s7 = scalar_lea.vmem %s772_s5, %s571_s28 }
  0x11   : > { %v273_v6 = vld [vmem:[%s247_s10] sm:$0xff]  ;;  %v725_v7 = vld [vmem:[%s247_s10 + $0x8] sm:$0xff]  ;;  %v275_v8 = vld [vmem:[%s247_s10 + $0x10] sm:$0xff]  ;;  %378 = vperm.xlu1 %623, %v270_v13  }
  0x12   : > { %v277_v9 = vpack.c.bf16 %v725_v7, %v273_v6  ;;  %v276_v10 = vld [vmem:[%s247_s10 + $0x18] sm:$0xff] }
  0x13   : > { %v278_v11 = vpack.c.bf16 %v276_v10, %v275_v8 }
  0x14   : > { %581 = vmatprep.subr.bf16.mxu0 %v277_v9  ;;  %383 = vperm.xlu0 %622, %v271_v15  }
  0x15   : > { %582 = vmatpush3.bf16.msra.mxu0 %v277_v9  ;;  %388 = vperm.xlu1 %623, %v272_v16  }
  0x16   : > { %583 = vmatprep.subr.bf16.mxu0 %v278_v11 }
  0x19   : > { %584 = vmatpush3.bf16.msra.mxu0 %v278_v11 }
  0x1c   : > { %586 = vmatmul.mubr.msk.bf16.vlgmr.msra.gmra.mrb[0].mxu0 %vm309_vm0, %v625_v14 }
  0x87   : > { %v282_v19 = vpop.permute.xlu0 %281 }
  0x88   : > { %v292_v18 = vpop.permute.xlu1 %291 }
  0x8b   : > { %v287_v26 = vpop.permute.xlu0 %286 }
  0x8c   : > { %v297_v23 = vpop.permute.xlu1 %296 }
  0x8f   : > { %v374_v37 = vpop.permute.xlu0 %373 }
  0x90   : > { %v379_v38 = vpop.permute.xlu1 %378 }
  0x93   : > { %v384_v39 = vpop.permute.xlu0 %383 }
  0x94   : > { %v389_v43 = vpop.permute.xlu1 %388 }
  0xef   : > { %v587_v20 = vpop.f32.mrb[0].mxu0 }
  0xf0   : > { %v359_v21 = vadd.f32 %v587_v20, %v292_v18  ;;  %v350_v22 = vpop.f32.mrb[1].mxu0 }
  0xf1   : > { %v351_v24 = vadd.f32 %v350_v22, %v282_v19  ;;  %v588_v25 = vpop.f32.mrb[2].mxu0 }
  0xf2   : > { %v362_v27 = vadd.f32 %v588_v25, %v297_v23  ;;  %v353_v28 = vpop.f32.mrb[3].mxu0  ;;  %v367_v30 = vmax.f32 %v359_v21, 0.0 }
  0xf3   : > { %v354_v29 = vadd.f32 %v353_v28, %v287_v26  ;;  %v365_v32 = vmax.f32 %v351_v24, 0.0 }
  0xf4   : > { %v368_v31 = vmax.f32 %v362_v27, 0.0 }
  0xf5   : > { %v366_v33 = vmax.f32 %v354_v29, 0.0 }
  0xf6   : > { %v370_v34 = vpack.c.bf16 %v368_v31, %v367_v30 }
  0xf7   : > { %v369_v35 = vpack.c.bf16 %v366_v33, %v365_v32 }
  0xf9   : > { %589 = vmatprep.subr.bf16.mxu1 %v369_v35 }
  0xfa   : > { %590 = vmatpush3.bf16.msra.mxu1 %v369_v35 }
  0xfb   : > { %591 = vmatprep.subr.bf16.mxu1 %v370_v34 }
  0xfe   : > { %592 = vmatpush3.bf16.msra.mxu1 %v370_v34 }
 0x101   : > { %594 = vmatmul.mubr.msk.bf16.vlgmr.msra.gmra.mrb[0].mxu1 %vm309_vm0, %v627_v36 }
 0x1d4   : > { %v595_v40 = vpop.f32.mrb[0].mxu1 }
 0x1d5   : > { %v450_v41 = vadd.f32 %v595_v40, %v384_v39  ;;  %v441_v42 = vpop.f32.mrb[1].mxu1 }
 0x1d6   : > { %v442_v44 = vadd.f32 %v441_v42, %v374_v37  ;;  %v596_v45 = vpop.f32.mrb[2].mxu1 }
 0x1d7   : > { %v458_v46 = vadd.f32 %v450_v41, %v275_v8  ;;  %v453_v47 = vadd.f32 %v596_v45, %v389_v43  ;;  %v444_v48 = vpop.f32.mrb[3].mxu1 }
 0x1d8   : > { %v456_v49 = vadd.f32 %v442_v44, %v273_v6  ;;  %v445_v50 = vadd.f32 %v444_v48, %v379_v38 }
 0x1d9   : > { %v462_v51 = vmax.f32 %v458_v46, 0.0  ;;  %v459_v52 = vadd.f32 %v453_v47, %v276_v10 }
 0x1da   : > { %v460_v53 = vmax.f32 %v456_v49, 0.0  ;;  %v457_v54 = vadd.f32 %v445_v50, %v725_v7 }
 0x1db   : > { %467 = vst.msk [vmem:[%s255_s7 + $0x10] sm:$0xff] %vm464_vm1, %v462_v51  ;;  %v463_v55 = vmax.f32 %v459_v52, 0.0 }
 0x1dc   : > { %465 = vst.msk [vmem:[%s255_s7] sm:$0xff] %vm464_vm1, %v460_v53  ;;  %v461_v56 = vmax.f32 %v457_v54, 0.0 }
 0x1dd   : > { %468 = vst.msk [vmem:[%s255_s7 + $0x18] sm:$0xff] %vm464_vm1, %v463_v55 }
 0x1de   : > { %466 = vst.msk [vmem:[%s255_s7 + $0x8] sm:$0xff] %vm464_vm1, %v461_v56 }
 0x1df PF: > { %s15_s20 = sadd.s32 1, %s650_s20   ;;  %s773_s18 = smov %s646_s19 }
 0x1e0   : > { %p12_p5 = scmp.ge.s32.totalorder %s15_s20, 4   ;;  %s774_s19 = smov %s776_s21 }
 0x1e2   :  { %14 = sbr.rel (!%p12_p5) target bundleno = 2 (0x2), region = 70 }

</bundles_post_ra>
